<compile_context>
chip_gen: v6e
topology: v6e:2x2x1
jax: 0.10.0
libtpu: 0.0.40
codegen_flags: <defaults>
</compile_context>

<pallas_src>
import functools
import random
from typing import NamedTuple

import numpy as np
import jax
import jax.numpy as jnp
from jax.experimental import pallas as pl
from jax.experimental.pallas import tpu as pltpu


def _round_up(x: int, m: int) -> int:
    return ((x + m - 1) // m) * m


# ---------------------------------------------------------------------------
# Per-generation hardware constants (queried once at import, with fallbacks)
# ---------------------------------------------------------------------------
def _tpu_env():
    vmem = 64 * 1024 * 1024            # conservative default (v7x-sized)
    try:
        vmem = int(pltpu.get_tpu_info().vmem_capacity_bytes)
    except Exception:
        pass
    kind = ""
    try:
        kind = jax.devices()[0].device_kind.lower()
    except Exception:
        pass
    is_v5 = "v5" in kind
    mxu_tile = 128 if is_v5 else 256   # v5e MXU is 4x128x128; v6e/v7x 2x256x256
    # Block budget / scoped-VMEM limit: ~48 MiB limit (40 MiB of blocks) on
    # v7x's 64 MiB physical VMEM, up to 96 MiB on 128 MiB chips.
    vmem_limit = max(min(int(0.75 * vmem), 96 * 1024 * 1024), 32 * 1024 * 1024)
    block_budget = vmem_limit - 8 * 1024 * 1024
    return mxu_tile, block_budget, vmem_limit


_MXU_TILE, _BLOCK_BUDGET, _VMEM_LIMIT = _tpu_env()
_ROW_Q = 128          # output-row padding quantum (compile-cache bucket)
_COL_Q = _MXU_TILE    # output-col padding quantum (lane + MXU-N fill)


# ---------------------------------------------------------------------------
# Interpolation weight matrices (numpy glue, cached per exact signature)
# ---------------------------------------------------------------------------
def _cubic_kernel(t: np.ndarray, a: float = -0.75) -> np.ndarray:
    t = np.abs(t)
    t2, t3 = t * t, t * t * t
    return np.where(
        t <= 1.0,
        (a + 2.0) * t3 - (a + 3.0) * t2 + 1.0,
        np.where(t < 2.0, a * t3 - 5.0 * a * t2 + 8.0 * a * t - 4.0 * a, 0.0),
    )


@functools.lru_cache(maxsize=None)
def _resample_matrix(out_size: int, in_size: int, interp: str) -> np.ndarray:
    """(out_size, in_size) resampling matrix, half-pixel convention, clamped."""
    scale = in_size / out_size
    dst = np.arange(out_size, dtype=np.float64)
    src = (dst + 0.5) * scale - 0.5
    i0 = np.floor(src).astype(np.int64)
    frac = src - i0
    w = np.zeros((out_size, in_size), dtype=np.float64)
    if interp == "bilinear":
        taps = ((0, 1.0 - frac), (1, frac))
    else:  # bicubic
        taps = tuple((k, _cubic_kernel(frac - k)) for k in (-1, 0, 1, 2))
    for k, wk in taps:
        idx = np.clip(i0 + k, 0, in_size - 1)
        np.add.at(w, (np.arange(out_size), idx), wk)
    return w.astype(np.float32)


@functools.lru_cache(maxsize=None)
def _padded_weights(H, W, new_h, new_w, interp, rows_first, nhp, nwp, kpad):
    """Zero-padded bf16 weight matrices matching the compiled plan's shapes.

    The padded shapes depend only on the plan (so the pallas compile is
    reused); the exact new_h/new_w/interp only change the array contents.
    Zero padding of the reduction rows/cols guarantees padded image regions
    contribute nothing.
    """
    if rows_first:
        wr = np.zeros((nhp, H), np.float32)
        wr[:new_h] = _resample_matrix(new_h, H, interp)
        wct = np.zeros((kpad, nwp), np.float32)          # kpad == padded W
        wct[:W, :new_w] = _resample_matrix(new_w, W, interp).T
    else:
        wr = np.zeros((nhp, kpad), np.float32)            # kpad == padded H
        wr[:new_h, :H] = _resample_matrix(new_h, H, interp)
        wct = np.zeros((W, nwp), np.float32)
        wct[:, :new_w] = _resample_matrix(new_w, W, interp).T
    # bf16 weights: native MXU rate, half the DMA bytes.  (f32 accumulation.)
    return jnp.asarray(wr, jnp.bfloat16), jnp.asarray(wct, jnp.bfloat16)


# ---------------------------------------------------------------------------
# Pallas kernel: one (channel, output-tile, K-chunk) step of the resize
# ---------------------------------------------------------------------------
def _resize_kernel(wr_ref, wct_ref, x_ref, o_ref, *, rows_first):
    # rows_first:
    #   wr_ref : (TM, H)        bf16 row-interp tile
    #   wct_ref: (TW, NWpad)    bf16 col-interp K-chunk (transposed)
    #   x_ref  : (H, TW)        f32 image K-chunk (channel squeezed)
    #   o_ref  : (TM, NWpad)    f32 output tile (resident across K)
    # cols_first:
    #   wr_ref : (NHpad, TK)    bf16 row-interp K-chunk
    #   wct_ref: (W, TN)        bf16 col-interp tile (transposed)
    #   x_ref  : (TK, W)        f32 image K-chunk
    #   o_ref  : (NHpad, TN)    f32 output tile (resident across K)
    @pl.when(pl.program_id(2) == 0)
    def _init():
        o_ref[...] = jnp.zeros_like(o_ref)

    # In-kernel bf16 cast (no wrapper-side pre-pass HBM round trip).
    x = x_ref[...].astype(jnp.bfloat16)
    if rows_first:
        tmp = jnp.dot(wr_ref[...], x, preferred_element_type=jnp.float32)
        o_ref[...] += jnp.dot(tmp.astype(jnp.bfloat16), wct_ref[...],
                              preferred_element_type=jnp.float32)
    else:
        tmp = jnp.dot(x, wct_ref[...], preferred_element_type=jnp.float32)
        o_ref[...] += jnp.dot(wr_ref[...], tmp.astype(jnp.bfloat16),
                              preferred_element_type=jnp.float32)


class _Plan(NamedTuple):
    rows_first: bool
    kpad: int      # padded length of the chunked reduction dim (W or H)
    pad_x: int     # how much the image must be padded along that dim


# ---------------------------------------------------------------------------
# Compiled plan, cached on padded geometry only (interp / exact output size
# never trigger a recompile -- they only change the runtime weight arrays).
# ---------------------------------------------------------------------------
@functools.lru_cache(maxsize=None)
def _compiled_plan(C, H, W, nhp, nwp, rows_first):
    budget = _BLOCK_BUDGET

    if rows_first:
        tm = _MXU_TILE if nhp % _MXU_TILE == 0 else 128

        def bytes_for(tm_, tw_):
            return (2 * tm_ * H * 2        # wr bf16, double-buffered
                    + 2 * tw_ * nwp * 2    # wct bf16, double-buffered
                    + 2 * H * tw_ * 4      # x f32, double-buffered
                    + 2 * tm_ * nwp * 4    # out f32, double-buffered
                    + tm_ * tw_ * 4)       # f32 intermediate

        if tm > 128 and bytes_for(tm, min(W, 128)) > budget:
            tm = 128
        if bytes_for(tm, W) <= budget:
            tw, kpad = W, W                # single K chunk: no image padding
        else:
            fixed = bytes_for(tm, 0)
            per = max(1, (bytes_for(tm, 128) - fixed) // 128)
            tw = max(128, ((budget - fixed) // per) // 128 * 128)
            tw = min(tw, _round_up(W, 128))
            kpad = _round_up(W, tw)
        n_k = max(1, kpad // tw)
        n_i = nhp // tm
        # Megacore balance: even number of parallel tiles when it is free
        # (single K chunk -> no extra image re-reads on v7x's 2 TCs).
        if n_k == 1 and (C * n_i) % 2 == 1 and tm >= 256:
            tm //= 2
            n_i = nhp // tm

        grid = (C, n_i, n_k)
        in_specs = [
            pl.BlockSpec((tm, H), lambda c, i, k: (i, 0)),
            pl.BlockSpec((tw, nwp), lambda c, i, k: (k, 0)),
            pl.BlockSpec((pl.Squeezed(), H, tw), lambda c, i, k: (c, 0, k)),
        ]
        out_specs = pl.BlockSpec((pl.Squeezed(), tm, nwp),
                                 lambda c, i, k: (c, i, 0))
        pad_axis, pad_x = 2, kpad - W
    else:
        tn = _MXU_TILE if nwp % _MXU_TILE == 0 else 128

        def bytes_for(tn_, tk_):
            return (2 * nhp * tk_ * 2      # wr bf16, double-buffered
                    + 2 * W * tn_ * 2      # wct bf16, double-buffered
                    + 2 * tk_ * W * 4      # x f32, double-buffered
                    + 2 * nhp * tn_ * 4    # out f32, double-buffered
                    + tk_ * tn_ * 4)       # f32 intermediate

        if tn > 128 and bytes_for(tn, min(H, 128)) > budget:
            tn = 128
        if bytes_for(tn, H) <= budget:
            tk, kpad = H, H
        else:
            fixed = bytes_for(tn, 0)
            per = max(1, (bytes_for(tn, 128) - fixed) // 128)
            tk = max(128, ((budget - fixed) // per) // 128 * 128)
            tk = min(tk, _round_up(H, 128))
            kpad = _round_up(H, tk)
        n_k = max(1, kpad // tk)
        n_j = nwp // tn
        if n_k == 1 and (C * n_j) % 2 == 1 and tn >= 256:
            tn //= 2
            n_j = nwp // tn

        grid = (C, n_j, n_k)
        in_specs = [
            pl.BlockSpec((nhp, tk), lambda c, j, k: (0, k)),
            pl.BlockSpec((W, tn), lambda c, j, k: (0, j)),
            pl.BlockSpec((pl.Squeezed(), tk, W), lambda c, j, k: (c, k, 0)),
        ]
        out_specs = pl.BlockSpec((pl.Squeezed(), nhp, tn),
                                 lambda c, j, k: (c, 0, j))
        pad_axis, pad_x = 1, kpad - H

    call = pl.pallas_call(
        functools.partial(_resize_kernel, rows_first=rows_first),
        out_shape=jax.ShapeDtypeStruct((C, nhp, nwp), jnp.float32),
        grid=grid,
        in_specs=in_specs,
        out_specs=out_specs,
        compiler_params=pltpu.CompilerParams(
            dimension_semantics=("parallel", "parallel", "arbitrary"),
            vmem_limit_bytes=_VMEM_LIMIT,
        ),
    )

    def _run(wr, wct, img):
        x = img
        if pad_x:  # only for huge images whose K dim had to be chunked
            pads = [(0, 0), (0, 0), (0, 0)]
            pads[pad_axis] = (0, pad_x)
            x = jnp.pad(x, pads)
        return call(wr, wct, x)

    return jax.jit(_run), _Plan(rows_first, kpad, pad_x)


def pallas_resize(img: jax.Array, new_h: int, new_w: int, interp: str) -> jax.Array:
    """Resize a CHW image to (C, new_h, new_w) with the given interpolation."""
    img = jnp.asarray(img).astype(jnp.float32)   # no-op for f32 inputs
    C, H, W = img.shape
    nhp = _round_up(new_h, _ROW_Q)
    nwp = _round_up(new_w, _COL_Q)
    # Cheaper separable order by exact MAC count (cols-first wins portrait).
    rows_first = new_h * W * (H + new_w) <= new_w * H * (W + new_h)
    run, plan = _compiled_plan(C, H, W, nhp, nwp, rows_first)
    wr, wct = _padded_weights(H, W, new_h, new_w, interp,
                              plan.rows_first, nhp, nwp, plan.kpad)
    out = run(wr, wct, img)                      # (C, nhp, nwp) padded slab
    return out[:, :new_h, :new_w]                # exact-size slice, outside jit


# ---------------------------------------------------------------------------
# Module equivalent
# ---------------------------------------------------------------------------
class RandomResizeWithRandomIntpl:
    """Resizes a CHW image to a random shorter-edge size with a random
    interpolation (bilinear or bicubic), mirroring the PyTorch forward pass."""

    def __init__(self, size_range=(112, 448)):
        self.size_range = size_range

    def __call__(self, img: jax.Array) -> jax.Array:
        # Host-side Python RNG, matching the original module's `random` calls
        # (no device round trips just to pick size/interp).
        size = random.randint(self.size_range[0], self.size_range[1])
        interp = random.choice(("bilinear", "bicubic"))

        img = jnp.asarray(img)
        C, H, W = img.shape
        # torchvision single-int semantics: shorter edge -> size, long edge
        # via int() truncation; unchanged if shorter edge already == size.
        if (H <= W and H == size) or (W <= H and W == size):
            return img.astype(jnp.float32)
        if H <= W:
            new_h, new_w = size, max(1, int(size * W / H))
        else:
            new_h, new_w = max(1, int(size * H / W)), size
        return pallas_resize(img, new_h, new_w, interp)

    def __repr__(self):
        return f"{self.__class__.__name__}() size_range={self.size_range})"


if __name__ == "__main__":
    random.seed(0)
    key = jax.random.PRNGKey(0)

    # Small synthetic "PIL-like" image: 3 channels, 16x16 spatial, values 0..255.
    img = jax.random.uniform(key, (3, 16, 16), dtype=jnp.float32) * 255.0
    img_np = np.asarray(img, np.float32)

    # Direct kernel check, rows-first path (landscape-ish output), bicubic.
    got = jax.block_until_ready(pallas_resize(img, 12, 20, "bicubic"))
    ref = np.einsum("oh,chw,pw->cop",
                    _resample_matrix(12, 16, "bicubic"), img_np,
                    _resample_matrix(20, 16, "bicubic"))
    np.testing.assert_allclose(np.asarray(got), ref, atol=8.0, rtol=0)

    # Direct kernel check, cols-first path (portrait-ish output), bilinear.
    got2 = jax.block_until_ready(pallas_resize(img, 24, 10, "bilinear"))
    ref2 = np.einsum("oh,chw,pw->cop",
                     _resample_matrix(24, 16, "bilinear"), img_np,
                     _resample_matrix(10, 16, "bilinear"))
    np.testing.assert_allclose(np.asarray(got2), ref2, atol=8.0, rtol=0)

    # Module-level randomized call at test scale.
    transform = RandomResizeWithRandomIntpl(size_range=(8, 24))
    out = jax.block_until_ready(transform(img))

    assert out.ndim == 3 and out.shape[0] == 3
    assert 8 <= min(out.shape[1], out.shape[2]) <= 24
    assert out.dtype == jnp.float32
    print("KERNEL_OK")
</pallas_src>

<mosaic_0001>
module attributes {stable_mosaic.version = 11 : i64} {
  func.func @_resize_kernel(%arg0: i32, %arg1: i32, %arg2: i32, %arg3: memref<128x16xbf16, #tpu.memory_space<vmem>>, %arg4: memref<16x256xbf16, #tpu.memory_space<vmem>>, %arg5: memref<1x16x16xf32, #tpu.memory_space<vmem>>, %arg6: memref<1x128x256xf32, #tpu.memory_space<vmem>>) attributes {dimension_semantics = [#tpu.dimension_semantics<parallel>, #tpu.dimension_semantics<parallel>, #tpu.dimension_semantics<arbitrary>], iteration_bounds = array<i64: 3, 1, 1>, scalar_prefetch = 0 : i64, scratch_operands = 0 : i64, tpu.core_type = #tpu.core_type<tc>, window_params = [{transform_indices = @transform_0, window_bounds = array<i64: 128, 16>}, {transform_indices = @transform_1, window_bounds = array<i64: 16, 256>}, {transform_indices = @transform_2, window_bounds = array<i64: 1, 16, 16>}, {transform_indices = @transform_3, window_bounds = array<i64: 1, 128, 256>}]} {
    %c0_i32 = arith.constant 0 : i32
    %0 = arith.cmpi eq, %arg2, %c0_i32 : i32
    %1 = arith.extui %0 : i1 to i32
    %c0_i32_0 = arith.constant 0 : i32
    %2 = arith.cmpi ne, %1, %c0_i32_0 : i32
    scf.if %2 {
      %cst_14 = arith.constant 0.000000e+00 : f32
      %17 = vector.broadcast %cst_14 : f32 to vector<128x256xf32>
      %c0_15 = arith.constant 0 : index
      %c0_16 = arith.constant 0 : index
      %c0_17 = arith.constant 0 : index
      %18 = vector.load %arg6[%c0_15, %c0_16, %c0_17] : memref<1x128x256xf32, #tpu.memory_space<vmem>>, vector<1x128x256xf32>
      %19 = vector.shape_cast %18 : vector<1x128x256xf32> to vector<128x256xf32>
      %20 = vector.shape_cast %17 : vector<128x256xf32> to vector<1x128x256xf32>
      tpu.vector_store %arg6[%c0_15, %c0_16, %c0_17], %20 {strides = array<i32>} : memref<1x128x256xf32, #tpu.memory_space<vmem>>, vector<1x128x256xf32>,
    } else {
    }
    %c0 = arith.constant 0 : index
    %c0_1 = arith.constant 0 : index
    %c0_2 = arith.constant 0 : index
    %3 = vector.load %arg5[%c0, %c0_1, %c0_2] : memref<1x16x16xf32, #tpu.memory_space<vmem>>, vector<1x16x16xf32>
    %4 = vector.shape_cast %3 : vector<1x16x16xf32> to vector<16x16xf32>
    %5 = arith.truncf %4 : vector<16x16xf32> to vector<16x16xbf16>
    %c0_3 = arith.constant 0 : index
    %c0_4 = arith.constant 0 : index
    %6 = vector.load %arg3[%c0_3, %c0_4] : memref<128x16xbf16, #tpu.memory_space<vmem>>, vector<128x16xbf16>
    %cst = arith.constant dense<0.000000e+00> : vector<128x16xf32>
    %7 = tpu.matmul %6, %5, %cst {dimension_numbers = #tpu.dot_dimension_numbers<[1], [0], [0], [1], [0, 0, 1, 1], [], []>} : vector<128x16xbf16>, vector<16x16xbf16>, vector<128x16xf32> -> vector<128x16xf32>
    %c0_5 = arith.constant 0 : index
    %c0_6 = arith.constant 0 : index
    %c0_7 = arith.constant 0 : index
    %8 = vector.load %arg6[%c0_5, %c0_6, %c0_7] : memref<1x128x256xf32, #tpu.memory_space<vmem>>, vector<1x128x256xf32>
    %9 = vector.shape_cast %8 : vector<1x128x256xf32> to vector<128x256xf32>
    %10 = arith.truncf %7 : vector<128x16xf32> to vector<128x16xbf16>
    %c0_8 = arith.constant 0 : index
    %c0_9 = arith.constant 0 : index
    %11 = vector.load %arg4[%c0_8, %c0_9] : memref<16x256xbf16, #tpu.memory_space<vmem>>, vector<16x256xbf16>
    %cst_10 = arith.constant dense<0.000000e+00> : vector<128x256xf32>
    %12 = tpu.matmul %10, %11, %cst_10 {dimension_numbers = #tpu.dot_dimension_numbers<[1], [0], [0], [1], [0, 0, 1, 1], [], []>} : vector<128x16xbf16>, vector<16x256xbf16>, vector<128x256xf32> -> vector<128x256xf32>
    %13 = arith.addf %9, %12 : vector<128x256xf32>
    %c0_11 = arith.constant 0 : index
    %c0_12 = arith.constant 0 : index
    %c0_13 = arith.constant 0 : index
    %14 = vector.load %arg6[%c0_11, %c0_12, %c0_13] : memref<1x128x256xf32, #tpu.memory_space<vmem>>, vector<1x128x256xf32>
    %15 = vector.shape_cast %14 : vector<1x128x256xf32> to vector<128x256xf32>
    %16 = vector.shape_cast %13 : vector<128x256xf32> to vector<1x128x256xf32>
    tpu.vector_store %arg6[%c0_11, %c0_12, %c0_13], %16 {strides = array<i32>} : memref<1x128x256xf32, #tpu.memory_space<vmem>>, vector<1x128x256xf32>,
    return
  }
  func.func @transform_0(%arg0: i32, %arg1: i32, %arg2: i32) -> (i32, i32) {
    %c0_i32 = arith.constant 0 : i32
    %c0_i32_0 = arith.constant 0 : i32
    return %arg1, %c0_i32 : i32, i32
  }
  func.func @transform_1(%arg0: i32, %arg1: i32, %arg2: i32) -> (i32, i32) {
    %c0_i32 = arith.constant 0 : i32
    %c0_i32_0 = arith.constant 0 : i32
    return %arg2, %c0_i32 : i32, i32
  }
  func.func @transform_2(%arg0: i32, %arg1: i32, %arg2: i32) -> (i32, i32, i32) {
    %c0_i32 = arith.constant 0 : i32
    %c0_i32_0 = arith.constant 0 : i32
    return %arg0, %c0_i32, %arg2 : i32, i32, i32
  }
  func.func @transform_3(%arg0: i32, %arg1: i32, %arg2: i32) -> (i32, i32, i32) {
    %c0_i32 = arith.constant 0 : i32
    %c0_i32_0 = arith.constant 0 : i32
    return %arg0, %arg1, %c0_i32 : i32, i32, i32
  }
}

</mosaic_0001>

<bundles_post_ra>
// kernel: _run.1
= control target key start
LH: loop header
LB: loop body
LE: loop exit
PB: predicated region body
PF: predicated region fallthrough
CT: control target
= control target key end

     0   :  { %8 = vsyncpa [#allocation3], 0  ;;  %s1292_s0 = inlined_call_operand.vmem [shape: bf16[128,16], index: 0, kind: input, shape index: {}]   ;;  %s1293_s1 = inlined_call_operand.vmem [shape: bf16[16,256], index: 1, kind: input, shape index: {}]   ;;  %s1294_s2 = inlined_call_operand.vmem [shape: f32[3,16,16], index: 2, kind: input, shape index: {}]   ;;  %s1295_s3 = inlined_call_operand.hbm [shape: f32[3,128,256], index: 3, kind: output, shape index: {}]  }
   0x1   :  { %10 = vsyncpa [#allocation3 + $0x1], 0  ;;  %s1093_s12 = smov 0   ;;  %s1095_s13 = smov 0  }
   0x2   :  { %s1097_s14 = smov 0   ;;  %s1099_s15 = smov 0  }
   0x3   :  { %s1101_s16 = smov 0   ;;  %s1103_s17 = smov 0  }
   0x4 LB: > { %s849_s18 = sadd.s32 4294967295, %s1067_s17   ;;  %s850_s19 = sadd.s32 4294967294, %s1067_s17   ;;  %s1067_s17 = sphi %s1103_s17, %s16_s17   ;;  %s1063_s16 = sphi %s1101_s16, %s1302_s16   ;;  %s1059_s15 = sphi %s1099_s15, %s1301_s15   ;;  %s1055_s14 = sphi %s1097_s14, %s1300_s14   ;;  %s1051_s13 = sphi %s1095_s13, %s1299_s13   ;;  %s1047_s12 = sphi %s1093_s12, %s1298_s12  }
   0x5   : > { %s35_s20 = sadd.s32 1, %s1063_s16  ;;  %s124_s21 = sadd.s32 1, %s1055_s14 }
   0x6   : > { %p37_p0 = scmp.ge.s32.totalorder %s35_s20, 3  ;;  %p134_p1 = scmp.ne.s32.totalorder %s1055_s14, %s1051_s13 }
   0x7   : > { %p135_p2 = scmp.eq.s32.totalorder %s849_s18, 2  ;;  %p140_p3 = scmp.ne.s32.totalorder %s1051_s13, %s1047_s12 }
   0x8   : > { %s1304_s20 = smov (%p37_p0, %s35_s20), 0  ;;  %p141_p5 = scmp.eq.s32.totalorder %s850_s19, 2 }
   0x9   : > { %p1133_p4 = por %p135_p2, %p134_p1  ;;  %s119_s23 = ssub.s32 %s1063_s16, %s1304_s20 }
   0xa   : > { %p855_p6 = scmp.ge.s32.totalorder %s1067_s17, 1  ;;  %p122_p7 = scmp.eq.s32.totalorder %s119_s23, 0 }
   0xb   : > { %p1140_p8 = por %p141_p5, %p140_p3  ;;  %p189_p9 = scmp.lt.s32.totalorder %s1067_s17, 4 }
   0xc   : > { %s1146_s25 = scalar_select %p122_p7, %s1055_s14, %s124_s21  }
   0xd   : > { %p190_p10 = pnand %p855_p6, %p189_p9 }
   0xe   : > { %p240_p11 = scmp.lt.s32.totalorder (!%p190_p10), %s1059_s15, 2  ;;  %s224_s7 = sand.u32 (!%p190_p10), 1, %s1051_s13  }
   0xf   : > { %193 = sbr.rel (%p190_p10) target bundleno = 493 (0x1ed), region = 32  ;;  %s856_s8 = sshll.u32 (!%p190_p10), %s224_s7, 8 }
  0x10   : > { %s1202_s9 = scalar_lea.vmem (!%p190_p10), [#allocation2], %s856_s8  ;;  %s891_s10 = sshll.u32 (!%p190_p10), %s1059_s15, 12 }
  0x11   : > { %s737_s11 = sshll.u32 (!%p190_p10), %s1202_s9, 4  ;;  %s1239_s21 = scalar_lea.hbm (!%p190_p10), %s1295_s3, %s891_s10  ;;  %s1241_s11 = int_to_ptr.vmem [resolvable:$true] %s737_s11 }
  0x12   : > { %s1247_s23 = scalar_lea.sflag (!%p190_p10), [#allocation3], %s224_s7  ;;  %s1070_s26 = smov (!%p190_p10), [#allocation2]  }
  0x13   : > { %s995_s27 = sshll.u32 (!%p190_p10), %s1070_s26, 4  ;;  %s996_s27 = int_to_ptr.vmem [resolvable:$false] %s995_s27 }
  0x14   : > { %v980_v0 = vld [vmem:[%s1292_s0] sm:$0xff]   ;;  %vm345_vm0 = vcmask 130048   ;;  %s241_s28 = scalar_select %p240_p11, %s1059_s15, 2  ;;  %v981_v4 = vld [vmem:[%s1292_s0 + $0x8] sm:$0xff]   ;;  %v982_v5 = vld [vmem:[%s1292_s0 + $0x10] sm:$0xff]   ;;  %v1069_v13 = vmov 0  }
  0x15   : > { %903 = vmatprep.mubr.msk.bf16.mxu0 %vm345_vm0, %v980_v0  ;;  %v983_v6 = vld [vmem:[%s1292_s0 + $0x18] sm:$0xff]   ;;  %v984_v7 = vld [vmem:[%s1292_s0 + $0x20] sm:$0xff]   ;;  %v985_v8 = vld [vmem:[%s1292_s0 + $0x28] sm:$0xff]   ;;  %595 = vmatprep.mubr.bf16.mxu1 %v1069_v13  ;;  %s991_s15 = scalar_lea.vmem %s1241_s11, 4096  ;;  %p998_p1 = scmp.lt.s32.totalorder %s1241_s11, %s996_s27 }
  0x16   : > { %s890_s29 = sshll.u32 %s241_s28, 4  ;;  %v986_v9 = vld [vmem:[%s1292_s0 + $0x30] sm:$0xff]   ;;  %v987_v10 = vld [vmem:[%s1292_s0 + $0x38] sm:$0xff]   ;;  %v990_v11 = vld [vmem:[%s1293_s1 + $0x4] ss:$8 sps:$4 sm:$0xff]   ;;  %p992_p12 = scmp.ne.s32.totalorder %s1241_s11, %s991_s15 }
  0x17   : > { %s247_s5 = scalar_lea.vmem %s1294_s2, %s890_s29  ;;  %v988_v12 = vld [vmem:[%s1293_s1] ss:$8 sps:$4 sm:$0xff]   ;;  %919 = vmatprep.subr.bf16.mxu1 %v990_v11  ;;  %s997_s28 = scalar_lea.vmem %s996_s27, 8192 }
  0x18   : > { %v286_v1 = vld [vmem:[%s247_s5] sm:$0xff]  ;;  %v287_v2 = vld [vmem:[%s247_s5 + $0x8] sm:$0xff]  ;;  %920 = vmatpush1.bf16.msra.mxu1 %v988_v12  ;;  %p993_p13 = pnand %p992_p12, %p1133_p4  ;;  %p999_p2 = scmp.lt.s32.totalorder %s997_s28, %s991_s15 }
  0x19   : > { %v288_v3 = vpack.c.bf16 %v287_v2, %v286_v1 }
  0x1a   : > { %p994_p0 = pneg %p993_p13  ;;  %p1000_p3 = por %p999_p2, %p998_p1 }
  0x1b   : > { %901 = vmatprep.subr.bf16.mxu0 %v288_v3 }
  0x1c   : > { %902 = vmatpush3.bf16.msra.mxu0 %v288_v3  ;;  %p1001_p5 = pnand %p1000_p3, %p994_p0 }
  0x1d   : > { %557 = vmatprep.subr.bf16.mxu0 %v990_v11 }
  0x1f   : > { %904 = vmatmul.mubr.msk.bf16.vlgmr.msra.gmra.mxu0 %vm345_vm0, %v981_v4 }
  0x20   : > { %907 = vmatprep.mubr.msk.bf16.mxu0 %vm345_vm0, %v982_v5  ;;  %558 = vmatpush1.bf16.msra.mxu0 %v988_v12 }
  0x27   : > { %908 = vmatmul.mubr.msk.bf16.gmra.mxu0 %vm345_vm0, %v983_v6 }
  0x28   : > { %911 = vmatprep.mubr.msk.bf16.mxu0 %vm345_vm0, %v984_v7 }
  0x2f   : > { %912 = vmatmul.mubr.msk.bf16.gmra.mxu0 %vm345_vm0, %v985_v8 }
  0x30   : > { %915 = vmatprep.mubr.msk.bf16.mxu0 %vm345_vm0, %v986_v9 }
  0x37   : > { %916 = vmatmul.mubr.msk.bf16.gmra.mxu0 %vm345_vm0, %v987_v10 }
  0x38   : > { %575 = vmatprep.mubr.bf16.mxu0 %v1069_v13 }
  0xdf   : > { %v905_v14 = vpop.f32.mrf.mxu0 }
  0xe1   : > { %v404_v15 = vpop.f32.mrf.mxu0 }
  0xe3   : > { %v906_v16 = vpop.f32.mrf.mxu0 }
  0xe4   : > { %v500_v23 = vpack.c.bf16 %v906_v16, %v905_v14 }
  0xe5   : > { %v407_v17 = vpop.f32.mrf.mxu0 }
  0xe6   : > { %v499_v18 = vpack.c.bf16 %v407_v17, %v404_v15 }
  0xe7   : > { %v909_v19 = vpop.f32.mrf.mxu0 }
  0xe8   : > { %877 = vmatmul.mubr.msk.bf16.vlgmr.msra.gmra.mxu0 %vm345_vm0, %v499_v18 }
  0xe9   : > { %v420_v20 = vpop.f32.mrf.mxu0  ;;  %585 = vmatprep.mubr.bf16.mxu0 %v1069_v13 }
  0xeb   : > { %v910_v21 = vpop.f32.mrf.mxu0 }
  0xec   : > { %v502_v27 = vpack.c.bf16 %v910_v21, %v909_v19 }
  0xed   : > { %v423_v22 = vpop.f32.mrf.mxu0 }
  0xee   : > { %v501_v24 = vpack.c.bf16 %v423_v22, %v420_v20 }
  0xef   : > { %v913_v25 = vpop.f32.mrf.mxu0 }
  0xf0   : > { %878 = vmatmul.mubr.msk.bf16.gmra.mxu0 %vm345_vm0, %v500_v23  ;;  %879 = vmatmul.mubr.msk.bf16.vlgmr.msra.gmra.mxu1 %vm345_vm0, %v501_v24 }
  0xf1   : > { %605 = vmatprep.mubr.bf16.mxu1 %v1069_v13  ;;  %v436_v26 = vpop.f32.mrf.mxu0 }
  0xf3   : > { %v914_v28 = vpop.f32.mrf.mxu0 }
  0xf4   : > { %v504_v33 = vpack.c.bf16 %v914_v28, %v913_v25 }
  0xf5   : > { %v439_v29 = vpop.f32.mrf.mxu0 }
  0xf6   : > { %v503_v30 = vpack.c.bf16 %v439_v29, %v436_v26 }
  0xf7   : > { %v917_v31 = vpop.f32.mrf.mxu0 }
  0xf8   : > { %880 = vmatmul.mubr.msk.bf16.gmra.mxu1 %vm345_vm0, %v502_v27 }
  0xf9   : > { %615 = vmatprep.mubr.bf16.mxu1 %v1069_v13  ;;  %v452_v32 = vpop.f32.mrf.mxu0 }
  0xfb   : > { %v918_v34 = vpop.f32.mrf.mxu0 }
  0xfc   : > { %v506_v37 = vpack.c.bf16 %v918_v34, %v917_v31 }
  0xfd   : > { %v455_v35 = vpop.f32.mrf.mxu0 }
  0xfe   : > { %v505_v36 = vpack.c.bf16 %v455_v35, %v452_v32 }
 0x100   : > { %881 = vmatmul.mubr.msk.bf16.gmra.mxu1 %vm345_vm0, %v503_v30 }
 0x101   : > { %625 = vmatprep.mubr.bf16.mxu1 %v1069_v13 }
 0x108   : > { %882 = vmatmul.mubr.msk.bf16.gmra.mxu1 %vm345_vm0, %v504_v33 }
 0x109   : > { %635 = vmatprep.mubr.bf16.mxu1 %v1069_v13 }
 0x110   : > { %883 = vmatmul.mubr.msk.bf16.gmra.mxu1 %vm345_vm0, %v505_v36 }
 0x111   : > { %645 = vmatprep.mubr.bf16.mxu1 %v1069_v13 }
 0x118   : > { %884 = vmatmul.mubr.msk.bf16.gmra.mxu1 %vm345_vm0, %v506_v37 }
 0x1a8   : > { %v577_v38 = vpop.f32.mrf.mxu0 }
 0x1a9   : > { %688 = vst [vmem:[%s1202_s9] sm:$0xff] %v577_v38 }
 0x1aa   : > { %v579_v39 = vpop.f32.mrf.mxu0 }
 0x1ab   : > { %689 = vst [vmem:[%s1202_s9 + $0x8] sm:$0xff] %v579_v39 }
 0x1ac   : > { %v581_v40 = vpop.f32.mrf.mxu0 }
 0x1ad   : > { %690 = vst [vmem:[%s1202_s9 + $0x10] sm:$0xff] %v581_v40 }
 0x1ae   : > { %v583_v41 = vpop.f32.mrf.mxu0 }
 0x1af   : > { %691 = vst [vmem:[%s1202_s9 + $0x18] sm:$0xff] %v583_v41 }
 0x1b0   : > { %v587_v42 = vpop.f32.mrf.mxu0  ;;  %v597_v43 = vpop.f32.mrf.mxu1 }
 0x1b1   : > { %692 = vst [vmem:[%s1202_s9 + $0x20] sm:$0xff] %v587_v42  ;;  %696 = vst [vmem:[%s1202_s9 + $0x40] sm:$0xff] %v597_v43 }
 0x1b2   : > { %v589_v44 = vpop.f32.mrf.mxu0  ;;  %v599_v45 = vpop.f32.mrf.mxu1 }
 0x1b3   : > { %693 = vst [vmem:[%s1202_s9 + $0x28] sm:$0xff] %v589_v44  ;;  %697 = vst [vmem:[%s1202_s9 + $0x48] sm:$0xff] %v599_v45 }
 0x1b4   : > { %v591_v46 = vpop.f32.mrf.mxu0  ;;  %v601_v47 = vpop.f32.mrf.mxu1 }
 0x1b5   : > { %694 = vst [vmem:[%s1202_s9 + $0x30] sm:$0xff] %v591_v46  ;;  %698 = vst [vmem:[%s1202_s9 + $0x50] sm:$0xff] %v601_v47 }
 0x1b6   : > { %v593_v48 = vpop.f32.mrf.mxu0  ;;  %v603_v49 = vpop.f32.mrf.mxu1 }
 0x1b7   : > { %695 = vst [vmem:[%s1202_s9 + $0x38] sm:$0xff] %v593_v48  ;;  %699 = vst [vmem:[%s1202_s9 + $0x58] sm:$0xff] %v603_v49 }
 0x1b8   : > { %v607_v50 = vpop.f32.mrf.mxu1 }
 0x1b9   : > { %700 = vst [vmem:[%s1202_s9 + $0x60] sm:$0xff] %v607_v50 }
 0x1ba   : > { %v609_v51 = vpop.f32.mrf.mxu1 }
 0x1bb   : > { %701 = vst [vmem:[%s1202_s9 + $0x68] sm:$0xff] %v609_v51 }
 0x1bc   : > { %v611_v52 = vpop.f32.mrf.mxu1 }
 0x1bd   : > { %702 = vst [vmem:[%s1202_s9 + $0x70] sm:$0xff] %v611_v52 }
 0x1be   : > { %v613_v53 = vpop.f32.mrf.mxu1 }
 0x1bf   : > { %703 = vst [vmem:[%s1202_s9 + $0x78] sm:$0xff] %v613_v53 }
 0x1c0   : > { %v617_v54 = vpop.f32.mrf.mxu1 }
 0x1c1   : > { %704 = vst [vmem:[%s1202_s9 + $0x80] sm:$0xff] %v617_v54 }
 0x1c2   : > { %v619_v55 = vpop.f32.mrf.mxu1 }
 0x1c3   : > { %705 = vst [vmem:[%s1202_s9 + $0x88] sm:$0xff] %v619_v55 }
 0x1c4   : > { %v621_v56 = vpop.f32.mrf.mxu1 }
 0x1c5   : > { %706 = vst [vmem:[%s1202_s9 + $0x90] sm:$0xff] %v621_v56 }
 0x1c6   : > { %v623_v57 = vpop.f32.mrf.mxu1 }
 0x1c7   : > { %707 = vst [vmem:[%s1202_s9 + $0x98] sm:$0xff] %v623_v57 }
 0x1c8   : > { %v627_v58 = vpop.f32.mrf.mxu1 }
 0x1c9   : > { %708 = vst [vmem:[%s1202_s9 + $0xa0] sm:$0xff] %v627_v58 }
 0x1ca   : > { %v629_v59 = vpop.f32.mrf.mxu1 }
 0x1cb   : > { %709 = vst [vmem:[%s1202_s9 + $0xa8] sm:$0xff] %v629_v59 }
 0x1cc   : > { %v631_v60 = vpop.f32.mrf.mxu1 }
 0x1cd   : > { %710 = vst [vmem:[%s1202_s9 + $0xb0] sm:$0xff] %v631_v60 }
 0x1ce   : > { %v633_v61 = vpop.f32.mrf.mxu1 }
 0x1cf   : > { %711 = vst [vmem:[%s1202_s9 + $0xb8] sm:$0xff] %v633_v61 }
 0x1d0   : > { %v637_v62 = vpop.f32.mrf.mxu1 }
 0x1d1   : > { %712 = vst [vmem:[%s1202_s9 + $0xc0] sm:$0xff] %v637_v62 }
 0x1d2   : > { %v639_v63 = vpop.f32.mrf.mxu1 }
 0x1d3   : > { %713 = vst [vmem:[%s1202_s9 + $0xc8] sm:$0xff] %v639_v63 }
 0x1d4   : > { %v641_v0 = vpop.f32.mrf.mxu1 }
 0x1d5   : > { %714 = vst [vmem:[%s1202_s9 + $0xd0] sm:$0xff] %v641_v0 }
 0x1d6   : > { %v643_v1 = vpop.f32.mrf.mxu1 }
 0x1d7   : > { %715 = vst [vmem:[%s1202_s9 + $0xd8] sm:$0xff] %v643_v1 }
 0x1d8   : > { %v647_v2 = vpop.f32.mrf.mxu1 }
 0x1d9   : > { %716 = vst [vmem:[%s1202_s9 + $0xe0] sm:$0xff] %v647_v2 }
 0x1da   : > { %v649_v3 = vpop.f32.mrf.mxu1 }
 0x1db   : > { %717 = vst [vmem:[%s1202_s9 + $0xe8] sm:$0xff] %v649_v3 }
 0x1dc   : > { %v651_v4 = vpop.f32.mrf.mxu1 }
 0x1dd   : > { %718 = vst [vmem:[%s1202_s9 + $0xf0] sm:$0xff] %v651_v4 }
 0x1de   : > { %v653_v5 = vpop.f32.mrf.mxu1 }
 0x1df   : > { %719 = vst [vmem:[%s1202_s9 + $0xf8] sm:$0xff] %v653_v5 }
 0x1e0   : > { %1004 = shalt.err (!%p1001_p5)
}
 0x1e1   : > { %s1005_s29 = scalar_lea.hbm %s1239_s21, 4096  ;;  %s1009_s5 = scalar_lea.hbm %s1295_s3, 12288 }
 0x1e2   : > { %p1006_p6 = scmp.ne.s32.totalorder %s1239_s21, %s1005_s29  ;;  %p1010_p10 = scmp.lt.s32.totalorder %s1239_s21, %s1295_s3 }
 0x1e3   : > { %p1011_p11 = scmp.lt.s32.totalorder %s1009_s5, %s1005_s29 }
 0x1e4   : > { %p1007_p7 = pnand %p1006_p6, %p1133_p4 }
 0x1e5   : > { %p1012_p12 = por %p1011_p11, %p1010_p10 }
 0x1e6   : > { %p1008_p9 = pneg %p1007_p7 }
 0x1e8   : > { %p1013_p13 = pnand %p1012_p12, %p1008_p9 }
 0x1ea   : > { %1016 = shalt.err (!%p1013_p13)
}
 0x1eb   : > { %s1071_s8 = smov 256   ;;  %s1072_s9 = smov 16  }
 0x1ec   : > { %921 = dma.vmem_to_hbm [thread:$0]  (%p1133_p4), %s1241_s11, 4096, %s1239_s21, %s1247_s23, %s1071_s8, %s1071_s8, %s1072_s9  }
 0x1ed PF: > { %p927_p0 = scmp.ge.s32.totalorder %s1067_s17, 2  ;;  %s752_s10 = sand.u32 1, %s1047_s12  }
 0x1ee   : > { %s753_s18 = scalar_lea.sflag [#allocation3], %s752_s10 }
 0x1ef   : > { %p924_p1 = pnand %p927_p0, %p1140_p8 }
 0x1f1   : > { %p925_p2 = pneg %p924_p1 }
 0x1f3   : > { %1042 = dma.done.wait (%p925_p2), %s753_s18, 4096  }
 0x1f4   : > { %1044 = vsyncadd (%p925_p2), %s753_s18, 4294963200  ;;  %s16_s17 = sadd.s32 1, %s1067_s17   ;;  %s1298_s12 = smov %s1051_s13 }
 0x1f5   : > { %p13_p3 = scmp.ge.s32.totalorder %s16_s17, 5   ;;  %s1299_s13 = smov %s1055_s14 }
 0x1f6   : > { %s1300_s14 = smov %s1146_s25  ;;  %s1301_s15 = smov %s1063_s16 }
 0x1f7   : > { %s1302_s16 = smov %s1304_s20  ;;  %15 = sbr.rel (!%p13_p3) target bundleno = 4 (0x4), region = 77 }
 0x1fc   :  { %758 = vsyncpa [#allocation3], 1 }
 0x1fd   :  { %760 = vsyncpa [#allocation3 + $0x1], 1 }

</bundles_post_ra>
